<compile_context>
chip_gen: v5e
topology: v5e:2x2
jax: 0.10.0
libtpu: 0.0.40
codegen_flags: <defaults>
</compile_context>

<pallas_src>
from functools import partial

import jax
import jax.numpy as jnp
from jax import lax
from jax.experimental import pallas as pl
from jax.experimental.pallas import tpu as pltpu


def _layernorm(x, gamma, beta, eps):
    mu = jnp.mean(x, axis=-1, keepdims=True)
    var = jnp.mean(jnp.square(x - mu), axis=-1, keepdims=True)
    return (x - mu) * lax.rsqrt(var + eps) * gamma + beta


def encoder_layer_kernel(xkv_ref, xq_ref, bias_ref,
                         g1_ref, be1_ref,
                         wq_ref, bq_ref, wkv_ref, bkv_ref,
                         wo_ref, bo_ref,
                         g2_ref, be2_ref,
                         w1_ref, b1_ref, w2_ref, b2_ref,
                         o_ref,
                         kv_ref,          # scratch: (T, 2D) bf16 cached [K | V]
                         *, num_heads, eps):
    f32, bf16 = jnp.float32, jnp.bfloat16
    qi = pl.program_id(1)

    x_q = xq_ref[0]                    # (tq, D) f32  query rows / residual
    bias = bias_ref[0]                 # (1, T)  f32  additive key mask (0 keep / -1e30 masked)
    tq, D = x_q.shape
    dk = D // num_heads
    scale = 1.0 / (dk ** 0.5)

    g1, be1 = g1_ref[0], be1_ref[0]

    # ---- per-batch K/V cache: computed once (qi == 0), reused by all query tiles ----
    @pl.when(qi == 0)
    def _():
        x_kv = xkv_ref[0].astype(f32)                              # (T, D)
        xn_kv = _layernorm(x_kv, g1, be1, eps)
        kv = jnp.dot(xn_kv.astype(bf16), wkv_ref[...],
                     preferred_element_type=f32) + bkv_ref[0]      # (T, 2D)
        kv_ref[...] = kv.astype(bf16)

    # ---- LayerNorm 1 + Q projection for this query tile ----
    xn_q = _layernorm(x_q, g1, be1, eps)
    q = jnp.dot(xn_q.astype(bf16), wq_ref[...], preferred_element_type=f32) + bq_ref[0]
    q_b = (q * scale).astype(bf16)                                 # (tq, D), 1/sqrt(dk) folded

    k_b = kv_ref[:, :D]                                            # (T, D) bf16
    v_b = kv_ref[:, D:]                                            # (T, D) bf16

    nt_dims = (((1,), (1,)), ((), ()))   # contract last dims: A @ B^T, no transpose op

    # ---- multi-head attention (static unroll over heads) ----
    ctx_parts = []
    for h in range(num_heads):
        sl = slice(h * dk, (h + 1) * dk)
        s = lax.dot_general(q_b[:, sl], k_b[:, sl], nt_dims,
                            preferred_element_type=f32)            # (tq, T) f32
        s = s + bias                                                # masked keys -> -1e30
        s = s - jnp.max(s, axis=-1, keepdims=True)
        e = jnp.exp(s)
        inv = pl.reciprocal(jnp.sum(e, axis=-1, keepdims=True), approx=True)
        # masked keys underflow to exactly 0 after the -1e30 bias, so the explicit
        # masked_fill(p, 0.0) select is skipped (only fully-padded rows differ).
        p = (e * inv).astype(bf16)
        ctx_parts.append(jnp.dot(p, v_b[:, sl], preferred_element_type=f32))  # (tq, dk)

    ctx = jnp.concatenate(ctx_parts, axis=-1).astype(bf16)          # (tq, D)
    # one K=D output-projection matmul (fills the MXU systolic depth)
    attn = jnp.dot(ctx, wo_ref[...], preferred_element_type=f32) + bo_ref[0]

    x1 = x_q + attn                                  # dropout = identity at inference

    # ---- LayerNorm 2 + positionwise feed-forward ----
    xn2 = _layernorm(x1, g2_ref[0], be2_ref[0], eps)
    h1 = jnp.dot(xn2.astype(bf16), w1_ref[...], preferred_element_type=f32) + b1_ref[0]
    h1 = jnp.maximum(h1, 0.0)
    ff = jnp.dot(h1.astype(bf16), w2_ref[...], preferred_element_type=f32) + b2_ref[0]

    o_ref[0] = x1 + ff


def _vmem_limit_bytes():
    # ~75% of physical per-core VMEM (v5e/v6e: 128 MiB -> 96 MiB, v7x: 64 -> 48),
    # capped at 100 MiB; conservative fallback if the query is unavailable.
    try:
        cap = int(pltpu.get_tpu_info().vmem_capacity_bytes)
    except Exception:
        cap = 64 * 1024 * 1024
    return min(cap * 3 // 4, 100 * 1024 * 1024)


def _default_tq(T):
    # v6e/v7x MXUs are 256 deep: prefer tq=256, then 128, else full T.
    # (On v5e, tq=128 already fills the 128-deep MXU — pass tq=128 there.)
    for cand in (256, 128):
        if T % cand == 0:
            return cand
    return T


def encoder_layer(x, mask, params, *, num_heads, eps=1e-5, tq=None):
    """x: (B, T, D) f32, mask: (B, T) bool (True = keep). Returns (y, mask)."""
    B, T, D = x.shape
    assert D % num_heads == 0, "hidden dim must be divisible by num_heads"
    U = params["w1"].shape[1]

    if tq is None:
        tq = _default_tq(T)
    assert T % tq == 0 and (tq % 8 == 0 or tq == T)
    n_q = T // tq

    bf16 = jnp.bfloat16
    x_bf16 = x.astype(bf16)                                              # K/V-path stream
    mask_bias = jnp.where(mask[:, None, :], 0.0, -1e30).astype(jnp.float32)  # (B,1,T)

    wq = params["wq"].astype(bf16)
    wkv = jnp.concatenate([params["wk"], params["wv"]], axis=1).astype(bf16)  # (D, 2D)
    bkv = jnp.concatenate([params["bk"], params["bv"]], axis=1)               # (1, 2D)
    wo = params["wo"].astype(bf16)
    w1 = params["w1"].astype(bf16)
    w2 = params["w2"].astype(bf16)

    def const_spec(shape):
        # Constant-index resident block: single-buffered (halves weight VMEM).
        return pl.BlockSpec(shape, lambda b, qi: (0,) * len(shape),
                            pipeline_mode=pl.Buffered(1))

    in_specs = [
        pl.BlockSpec((1, T, D), lambda b, qi: (b, 0, 0)),    # x bf16 (full seq, K/V path)
        pl.BlockSpec((1, tq, D), lambda b, qi: (b, qi, 0)),  # x f32 (query tile / residual)
        pl.BlockSpec((1, 1, T), lambda b, qi: (b, 0, 0)),    # additive key-mask bias
        const_spec((1, D)), const_spec((1, D)),              # norm1 gamma, beta
        const_spec((D, D)), const_spec((1, D)),              # Wq (bf16), bq
        const_spec((D, 2 * D)), const_spec((1, 2 * D)),      # fused Wkv (bf16), bkv
        const_spec((D, D)), const_spec((1, D)),              # Wo (bf16), bo
        const_spec((1, D)), const_spec((1, D)),              # norm2 gamma, beta
        const_spec((D, U)), const_spec((1, U)),              # FFN W1 (bf16), b1
        const_spec((U, D)), const_spec((1, D)),              # FFN W2 (bf16), b2
    ]
    out_spec = pl.BlockSpec((1, tq, D), lambda b, qi: (b, qi, 0))

    kernel = partial(encoder_layer_kernel, num_heads=num_heads, eps=eps)
    y = pl.pallas_call(
        kernel,
        out_shape=jax.ShapeDtypeStruct((B, T, D), jnp.float32),
        grid_spec=pltpu.PrefetchScalarGridSpec(
            num_scalar_prefetch=0,
            grid=(B, n_q),                       # qi innermost -> per-batch K/V cache valid
            in_specs=in_specs,
            out_specs=out_spec,
            scratch_shapes=[pltpu.VMEM((T, 2 * D), bf16)],   # cached [K | V] (bf16)
        ),
        compiler_params=pltpu.CompilerParams(
            # B is megacore-parallel (v7x 2 TCs shard batches); qi must stay
            # "arbitrary" because it reuses the K/V scratch written at qi == 0.
            dimension_semantics=("parallel", "arbitrary"),
            vmem_limit_bytes=_vmem_limit_bytes(),
        ),
    )(x_bf16, x, mask_bias,
      params["g1"], params["be1"],
      wq, params["bq"], wkv, bkv,
      wo, params["bo"],
      params["g2"], params["be2"],
      w1, params["b1"], w2, params["b2"])
    return y, mask


def encoder_layer_reference(x, mask, params, *, num_heads, eps=1e-5):
    """Pure-JAX f32 reference mirroring the PyTorch module."""
    B, T, D = x.shape
    dk = D // num_heads

    def ln(z, g, b):
        mu = z.mean(-1, keepdims=True)
        var = ((z - mu) ** 2).mean(-1, keepdims=True)
        return (z - mu) / jnp.sqrt(var + eps) * g + b

    xn = ln(x, params["g1"], params["be1"])
    q = xn @ params["wq"] + params["bq"]
    k = xn @ params["wk"] + params["bk"]
    v = xn @ params["wv"] + params["bv"]
    qh = q.reshape(B, T, num_heads, dk).transpose(0, 2, 1, 3)
    kh = k.reshape(B, T, num_heads, dk).transpose(0, 2, 1, 3)
    vh = v.reshape(B, T, num_heads, dk).transpose(0, 2, 1, 3)
    s = jnp.einsum("bhqd,bhkd->bhqk", qh, kh) / jnp.sqrt(dk)
    keym = mask[:, None, None, :]
    s = jnp.where(keym, s, -1e30)
    p = jax.nn.softmax(s, axis=-1)
    p = jnp.where(keym, p, 0.0)
    ctx = jnp.einsum("bhqk,bhkd->bhqd", p, vh).transpose(0, 2, 1, 3).reshape(B, T, D)
    x1 = x + (ctx @ params["wo"] + params["bo"])
    xn2 = ln(x1, params["g2"], params["be2"])
    ff = jnp.maximum(xn2 @ params["w1"] + params["b1"], 0.0) @ params["w2"] + params["b2"]
    return x1 + ff, mask


def init_params(key, D, U):
    ks = jax.random.split(key, 6)
    scale = 0.02
    return {
        "g1": jnp.ones((1, D), jnp.float32),
        "be1": jnp.zeros((1, D), jnp.float32),
        "wq": scale * jax.random.normal(ks[0], (D, D), jnp.float32),
        "bq": jnp.zeros((1, D), jnp.float32),
        "wk": scale * jax.random.normal(ks[1], (D, D), jnp.float32),
        "bk": jnp.zeros((1, D), jnp.float32),
        "wv": scale * jax.random.normal(ks[2], (D, D), jnp.float32),
        "bv": jnp.zeros((1, D), jnp.float32),
        "wo": scale * jax.random.normal(ks[3], (D, D), jnp.float32),
        "bo": jnp.zeros((1, D), jnp.float32),
        "g2": jnp.ones((1, D), jnp.float32),
        "be2": jnp.zeros((1, D), jnp.float32),
        "w1": scale * jax.random.normal(ks[4], (D, U), jnp.float32),
        "b1": jnp.zeros((1, U), jnp.float32),
        "w2": scale * jax.random.normal(ks[5], (U, D), jnp.float32),
        "b2": jnp.zeros((1, D), jnp.float32),
    }


if __name__ == "__main__":
    B, T, D, H, U = 2, 8, 32, 4, 64   # batch, seq, hidden, heads, ffn units

    key = jax.random.PRNGKey(0)
    kx, kp = jax.random.split(key)
    x = jax.random.normal(kx, (B, T, D), jnp.float32)
    # mask: True = valid position (lengths 8 and 5)
    lengths = jnp.array([8, 5], jnp.int32)
    mask = jnp.arange(T)[None, :] < lengths[:, None]

    params = init_params(kp, D, U)

    y, mask_out = encoder_layer(x, mask, params, num_heads=H)
    jax.block_until_ready(y)

    assert y.shape == (B, T, D) and y.dtype == jnp.float32
    assert bool(jnp.all(jnp.isfinite(y)))

    y_ref, _ = encoder_layer_reference(x, mask, params, num_heads=H)
    err = float(jnp.max(jnp.abs(y - y_ref)))
    assert err < 5e-2, f"max abs diff vs reference too large: {err}"

    print("KERNEL_OK")
</pallas_src>

<mosaic_0001>
module attributes {stable_mosaic.version = 11 : i64} {
  func.func @encoder_layer_kernel(%arg0: i32, %arg1: i32, %arg2: memref<1x8x32xbf16, #tpu.memory_space<vmem>>, %arg3: memref<1x8x32xf32, #tpu.memory_space<vmem>>, %arg4: memref<1x1x8xf32, #tpu.memory_space<vmem>>, %arg5: memref<1x32xf32, #tpu.memory_space<vmem>>, %arg6: memref<1x32xf32, #tpu.memory_space<vmem>>, %arg7: memref<32x32xbf16, #tpu.memory_space<vmem>>, %arg8: memref<1x32xf32, #tpu.memory_space<vmem>>, %arg9: memref<32x64xbf16, #tpu.memory_space<vmem>>, %arg10: memref<1x64xf32, #tpu.memory_space<vmem>>, %arg11: memref<32x32xbf16, #tpu.memory_space<vmem>>, %arg12: memref<1x32xf32, #tpu.memory_space<vmem>>, %arg13: memref<1x32xf32, #tpu.memory_space<vmem>>, %arg14: memref<1x32xf32, #tpu.memory_space<vmem>>, %arg15: memref<32x64xbf16, #tpu.memory_space<vmem>>, %arg16: memref<1x64xf32, #tpu.memory_space<vmem>>, %arg17: memref<64x32xbf16, #tpu.memory_space<vmem>>, %arg18: memref<1x32xf32, #tpu.memory_space<vmem>>, %arg19: memref<1x8x32xf32, #tpu.memory_space<vmem>>, %arg20: memref<8x64xbf16, #tpu.memory_space<vmem>>) attributes {dimension_semantics = [#tpu.dimension_semantics<parallel>, #tpu.dimension_semantics<arbitrary>], iteration_bounds = array<i64: 2, 1>, scalar_prefetch = 0 : i64, scratch_operands = 1 : i64, tpu.core_type = #tpu.core_type<tc>, window_params = [{transform_indices = @transform_0, window_bounds = array<i64: 1, 8, 32>}, {transform_indices = @transform_1, window_bounds = array<i64: 1, 8, 32>}, {transform_indices = @transform_2, window_bounds = array<i64: 1, 1, 8>}, {pipeline_mode = #tpu.pipeline_mode<synchronous>, transform_indices = @transform_3, window_bounds = array<i64: 1, 32>}, {pipeline_mode = #tpu.pipeline_mode<synchronous>, transform_indices = @transform_4, window_bounds = array<i64: 1, 32>}, {pipeline_mode = #tpu.pipeline_mode<synchronous>, transform_indices = @transform_5, window_bounds = array<i64: 32, 32>}, {pipeline_mode = #tpu.pipeline_mode<synchronous>, transform_indices = @transform_6, window_bounds = array<i64: 1, 32>}, {pipeline_mode = #tpu.pipeline_mode<synchronous>, transform_indices = @transform_7, window_bounds = array<i64: 32, 64>}, {pipeline_mode = #tpu.pipeline_mode<synchronous>, transform_indices = @transform_8, window_bounds = array<i64: 1, 64>}, {pipeline_mode = #tpu.pipeline_mode<synchronous>, transform_indices = @transform_9, window_bounds = array<i64: 32, 32>}, {pipeline_mode = #tpu.pipeline_mode<synchronous>, transform_indices = @transform_10, window_bounds = array<i64: 1, 32>}, {pipeline_mode = #tpu.pipeline_mode<synchronous>, transform_indices = @transform_11, window_bounds = array<i64: 1, 32>}, {pipeline_mode = #tpu.pipeline_mode<synchronous>, transform_indices = @transform_12, window_bounds = array<i64: 1, 32>}, {pipeline_mode = #tpu.pipeline_mode<synchronous>, transform_indices = @transform_13, window_bounds = array<i64: 32, 64>}, {pipeline_mode = #tpu.pipeline_mode<synchronous>, transform_indices = @transform_14, window_bounds = array<i64: 1, 64>}, {pipeline_mode = #tpu.pipeline_mode<synchronous>, transform_indices = @transform_15, window_bounds = array<i64: 64, 32>}, {pipeline_mode = #tpu.pipeline_mode<synchronous>, transform_indices = @transform_16, window_bounds = array<i64: 1, 32>}, {transform_indices = @transform_17, window_bounds = array<i64: 1, 8, 32>}]} {
    %c0 = arith.constant 0 : index
    %c0_0 = arith.constant 0 : index
    %c0_1 = arith.constant 0 : index
    %0 = vector.load %arg3[%c0, %c0_0, %c0_1] : memref<1x8x32xf32, #tpu.memory_space<vmem>>, vector<1x8x32xf32>
    %1 = vector.shape_cast %0 : vector<1x8x32xf32> to vector<8x32xf32>
    %c0_2 = arith.constant 0 : index
    %c0_3 = arith.constant 0 : index
    %c0_4 = arith.constant 0 : index
    %2 = vector.load %arg4[%c0_2, %c0_3, %c0_4] : memref<1x1x8xf32, #tpu.memory_space<vmem>>, vector<1x1x8xf32>
    %3 = vector.shape_cast %2 : vector<1x1x8xf32> to vector<1x8xf32>
    %c0_5 = arith.constant 0 : index
    %c0_6 = arith.constant 0 : index
    %4 = vector.load %arg5[%c0_5, %c0_6] : memref<1x32xf32, #tpu.memory_space<vmem>>, vector<1x32xf32>
    %5 = vector.shape_cast %4 : vector<1x32xf32> to vector<32xf32>
    %c0_7 = arith.constant 0 : index
    %c0_8 = arith.constant 0 : index
    %6 = vector.load %arg6[%c0_7, %c0_8] : memref<1x32xf32, #tpu.memory_space<vmem>>, vector<1x32xf32>
    %7 = vector.shape_cast %6 : vector<1x32xf32> to vector<32xf32>
    %c0_i32 = arith.constant 0 : i32
    %8 = arith.cmpi eq, %arg1, %c0_i32 : i32
    %9 = arith.extui %8 : i1 to i32
    %c0_i32_9 = arith.constant 0 : i32
    %10 = arith.cmpi ne, %9, %c0_i32_9 : i32
    scf.if %10 {
      %c0_67 = arith.constant 0 : index
      %c0_68 = arith.constant 0 : index
      %c0_69 = arith.constant 0 : index
      %180 = vector.load %arg2[%c0_67, %c0_68, %c0_69] : memref<1x8x32xbf16, #tpu.memory_space<vmem>>, vector<1x8x32xbf16>
      %181 = vector.shape_cast %180 : vector<1x8x32xbf16> to vector<8x32xbf16>
      %182 = arith.extf %181 : vector<8x32xbf16> to vector<8x32xf32>
      %cst_70 = arith.constant dense<0.000000e+00> : vector<8xf32>
      %183 = vector.multi_reduction <add>, %182, %cst_70 [1] : vector<8x32xf32> to vector<8xf32>
      %184 = vector.shape_cast %183 : vector<8xf32> to vector<8x1xf32>
      %cst_71 = arith.constant 3.200000e+01 : f32
      %185 = vector.broadcast %cst_71 : f32 to vector<8x1xf32>
      %186 = arith.divf %184, %185 : vector<8x1xf32>
      %187 = vector.broadcast %186 : vector<8x1xf32> to vector<8x32xf32>
      %188 = arith.subf %182, %187 : vector<8x32xf32>
      %189 = arith.mulf %188, %188 : vector<8x32xf32>
      %cst_72 = arith.constant dense<0.000000e+00> : vector<8xf32>
      %190 = vector.multi_reduction <add>, %189, %cst_72 [1] : vector<8x32xf32> to vector<8xf32>
      %191 = vector.shape_cast %190 : vector<8xf32> to vector<8x1xf32>
      %cst_73 = arith.constant 3.200000e+01 : f32
      %192 = vector.broadcast %cst_73 : f32 to vector<8x1xf32>
      %193 = arith.divf %191, %192 : vector<8x1xf32>
      %194 = vector.broadcast %186 : vector<8x1xf32> to vector<8x32xf32>
      %195 = arith.subf %182, %194 : vector<8x32xf32>
      %cst_74 = arith.constant 9.99999974E-6 : f32
      %196 = vector.broadcast %cst_74 : f32 to vector<8x1xf32>
      %197 = arith.addf %193, %196 : vector<8x1xf32>
      %198 = math.rsqrt %197 : vector<8x1xf32>
      %199 = vector.broadcast %198 : vector<8x1xf32> to vector<8x32xf32>
      %200 = arith.mulf %195, %199 : vector<8x32xf32>
      %201 = vector.shape_cast %5 : vector<32xf32> to vector<1x32xf32>
      %202 = vector.broadcast %201 : vector<1x32xf32> to vector<8x32xf32>
      %203 = arith.mulf %200, %202 : vector<8x32xf32>
      %204 = vector.shape_cast %7 : vector<32xf32> to vector<1x32xf32>
      %205 = vector.broadcast %204 : vector<1x32xf32> to vector<8x32xf32>
      %206 = arith.addf %203, %205 : vector<8x32xf32>
      %207 = arith.truncf %206 : vector<8x32xf32> to vector<8x32xbf16>
      %c0_75 = arith.constant 0 : index
      %c0_76 = arith.constant 0 : index
      %208 = vector.load %arg9[%c0_75, %c0_76] : memref<32x64xbf16, #tpu.memory_space<vmem>>, vector<32x64xbf16>
      %cst_77 = arith.constant dense<0.000000e+00> : vector<8x64xf32>
      %209 = tpu.matmul %207, %208, %cst_77 {dimension_numbers = #tpu.dot_dimension_numbers<[1], [0], [0], [1], [0, 0, 1, 1], [], []>} : vector<8x32xbf16>, vector<32x64xbf16>, vector<8x64xf32> -> vector<8x64xf32>
      %c0_78 = arith.constant 0 : index
      %c0_79 = arith.constant 0 : index
      %210 = vector.load %arg10[%c0_78, %c0_79] : memref<1x64xf32, #tpu.memory_space<vmem>>, vector<1x64xf32>
      %211 = vector.shape_cast %210 : vector<1x64xf32> to vector<64xf32>
      %212 = vector.shape_cast %211 : vector<64xf32> to vector<1x64xf32>
      %213 = vector.broadcast %212 : vector<1x64xf32> to vector<8x64xf32>
      %214 = arith.addf %209, %213 : vector<8x64xf32>
      %215 = arith.truncf %214 : vector<8x64xf32> to vector<8x64xbf16>
      %c0_80 = arith.constant 0 : index
      %c0_81 = arith.constant 0 : index
      %216 = vector.load %arg20[%c0_80, %c0_81] : memref<8x64xbf16, #tpu.memory_space<vmem>>, vector<8x64xbf16>
      tpu.vector_store %arg20[%c0_80, %c0_81], %215 {strides = array<i32>} : memref<8x64xbf16, #tpu.memory_space<vmem>>, vector<8x64xbf16>,
    } else {
    }
    %cst = arith.constant dense<0.000000e+00> : vector<8xf32>
    %11 = vector.multi_reduction <add>, %1, %cst [1] : vector<8x32xf32> to vector<8xf32>
    %12 = vector.shape_cast %11 : vector<8xf32> to vector<8x1xf32>
    %cst_10 = arith.constant 3.200000e+01 : f32
    %13 = vector.broadcast %cst_10 : f32 to vector<8x1xf32>
    %14 = arith.divf %12, %13 : vector<8x1xf32>
    %15 = vector.broadcast %14 : vector<8x1xf32> to vector<8x32xf32>
    %16 = arith.subf %1, %15 : vector<8x32xf32>
    %17 = arith.mulf %16, %16 : vector<8x32xf32>
    %cst_11 = arith.constant dense<0.000000e+00> : vector<8xf32>
    %18 = vector.multi_reduction <add>, %17, %cst_11 [1] : vector<8x32xf32> to vector<8xf32>
    %19 = vector.shape_cast %18 : vector<8xf32> to vector<8x1xf32>
    %cst_12 = arith.constant 3.200000e+01 : f32
    %20 = vector.broadcast %cst_12 : f32 to vector<8x1xf32>
    %21 = arith.divf %19, %20 : vector<8x1xf32>
    %22 = vector.broadcast %14 : vector<8x1xf32> to vector<8x32xf32>
    %23 = arith.subf %1, %22 : vector<8x32xf32>
    %cst_13 = arith.constant 9.99999974E-6 : f32
    %24 = vector.broadcast %cst_13 : f32 to vector<8x1xf32>
    %25 = arith.addf %21, %24 : vector<8x1xf32>
    %26 = math.rsqrt %25 : vector<8x1xf32>
    %27 = vector.broadcast %26 : vector<8x1xf32> to vector<8x32xf32>
    %28 = arith.mulf %23, %27 : vector<8x32xf32>
    %29 = vector.shape_cast %5 : vector<32xf32> to vector<1x32xf32>
    %30 = vector.broadcast %29 : vector<1x32xf32> to vector<8x32xf32>
    %31 = arith.mulf %28, %30 : vector<8x32xf32>
    %32 = vector.shape_cast %7 : vector<32xf32> to vector<1x32xf32>
    %33 = vector.broadcast %32 : vector<1x32xf32> to vector<8x32xf32>
    %34 = arith.addf %31, %33 : vector<8x32xf32>
    %35 = arith.truncf %34 : vector<8x32xf32> to vector<8x32xbf16>
    %c0_14 = arith.constant 0 : index
    %c0_15 = arith.constant 0 : index
    %36 = vector.load %arg7[%c0_14, %c0_15] : memref<32x32xbf16, #tpu.memory_space<vmem>>, vector<32x32xbf16>
    %cst_16 = arith.constant dense<0.000000e+00> : vector<8x32xf32>
    %37 = tpu.matmul %35, %36, %cst_16 {dimension_numbers = #tpu.dot_dimension_numbers<[1], [0], [0], [1], [0, 0, 1, 1], [], []>} : vector<8x32xbf16>, vector<32x32xbf16>, vector<8x32xf32> -> vector<8x32xf32>
    %c0_17 = arith.constant 0 : index
    %c0_18 = arith.constant 0 : index
    %38 = vector.load %arg8[%c0_17, %c0_18] : memref<1x32xf32, #tpu.memory_space<vmem>>, vector<1x32xf32>
    %39 = vector.shape_cast %38 : vector<1x32xf32> to vector<32xf32>
    %40 = vector.shape_cast %39 : vector<32xf32> to vector<1x32xf32>
    %41 = vector.broadcast %40 : vector<1x32xf32> to vector<8x32xf32>
    %42 = arith.addf %37, %41 : vector<8x32xf32>
    %cst_19 = arith.constant 0.353553385 : f32
    %43 = vector.broadcast %cst_19 : f32 to vector<8x32xf32>
    %44 = arith.mulf %42, %43 : vector<8x32xf32>
    %45 = arith.truncf %44 : vector<8x32xf32> to vector<8x32xbf16>
    %c0_20 = arith.constant 0 : index
    %c0_21 = arith.constant 0 : index
    %46 = vector.load %arg20[%c0_20, %c0_21] : memref<8x64xbf16, #tpu.memory_space<vmem>>, vector<8x32xbf16>
    %c0_22 = arith.constant 0 : index
    %c32 = arith.constant 32 : index
    %47 = vector.load %arg20[%c0_22, %c32] : memref<8x64xbf16, #tpu.memory_space<vmem>>, vector<8x32xbf16>
    %48 = vector.extract_strided_slice %45 {offsets = [0, 0], sizes = [8, 8], strides = [1, 1]} : vector<8x32xbf16> to vector<8x8xbf16>
    %49 = vector.extract_strided_slice %46 {offsets = [0, 0], sizes = [8, 8], strides = [1, 1]} : vector<8x32xbf16> to vector<8x8xbf16>
    %cst_23 = arith.constant dense<0.000000e+00> : vector<8x8xf32>
    %50 = tpu.matmul %48, %49, %cst_23 {dimension_numbers = #tpu.dot_dimension_numbers<[1], [1], [0], [0], [0, 0, 1, 0], [], []>} : vector<8x8xbf16>, vector<8x8xbf16>, vector<8x8xf32> -> vector<8x8xf32>
    %51 = vector.broadcast %3 : vector<1x8xf32> to vector<8x8xf32>
    %52 = arith.addf %50, %51 : vector<8x8xf32>
    %cst_24 = arith.constant dense<0xFF800000> : vector<8xf32>
    %53 = vector.multi_reduction <maximumf>, %52, %cst_24 [1] : vector<8x8xf32> to vector<8xf32>
    %54 = vector.shape_cast %53 : vector<8xf32> to vector<8x1xf32>
    %55 = vector.broadcast %54 : vector<8x1xf32> to vector<8x8xf32>
    %56 = arith.subf %52, %55 : vector<8x8xf32>
    %57 = math.exp %56 : vector<8x8xf32>
    %cst_25 = arith.constant dense<0.000000e+00> : vector<8xf32>
    %58 = vector.multi_reduction <add>, %57, %cst_25 [1] : vector<8x8xf32> to vector<8xf32>
    %59 = vector.shape_cast %58 : vector<8xf32> to vector<8x1xf32>
    %60 = tpu.reciprocal %59 {approx = true} : vector<8x1xf32> -> vector<8x1xf32>
    %61 = vector.broadcast %60 : vector<8x1xf32> to vector<8x8xf32>
    %62 = arith.mulf %57, %61 : vector<8x8xf32>
    %63 = arith.truncf %62 : vector<8x8xf32> to vector<8x8xbf16>
    %64 = vector.extract_strided_slice %47 {offsets = [0, 0], sizes = [8, 8], strides = [1, 1]} : vector<8x32xbf16> to vector<8x8xbf16>
    %cst_26 = arith.constant dense<0.000000e+00> : vector<8x8xf32>
    %65 = tpu.matmul %63, %64, %cst_26 {dimension_numbers = #tpu.dot_dimension_numbers<[1], [0], [0], [1], [0, 0, 1, 1], [], []>} : vector<8x8xbf16>, vector<8x8xbf16>, vector<8x8xf32> -> vector<8x8xf32>
    %66 = vector.extract_strided_slice %45 {offsets = [0, 8], sizes = [8, 8], strides = [1, 1]} : vector<8x32xbf16> to vector<8x8xbf16>
    %67 = vector.extract_strided_slice %46 {offsets = [0, 8], sizes = [8, 8], strides = [1, 1]} : vector<8x32xbf16> to vector<8x8xbf16>
    %cst_27 = arith.constant dense<0.000000e+00> : vector<8x8xf32>
    %68 = tpu.matmul %66, %67, %cst_27 {dimension_numbers = #tpu.dot_dimension_numbers<[1], [1], [0], [0], [0, 0, 1, 0], [], []>} : vector<8x8xbf16>, vector<8x8xbf16>, vector<8x8xf32> -> vector<8x8xf32>
    %69 = vector.broadcast %3 : vector<1x8xf32> to vector<8x8xf32>
    %70 = arith.addf %68, %69 : vector<8x8xf32>
    %cst_28 = arith.constant dense<0xFF800000> : vector<8xf32>
    %71 = vector.multi_reduction <maximumf>, %70, %cst_28 [1] : vector<8x8xf32> to vector<8xf32>
    %72 = vector.shape_cast %71 : vector<8xf32> to vector<8x1xf32>
    %73 = vector.broadcast %72 : vector<8x1xf32> to vector<8x8xf32>
    %74 = arith.subf %70, %73 : vector<8x8xf32>
    %75 = math.exp %74 : vector<8x8xf32>
    %cst_29 = arith.constant dense<0.000000e+00> : vector<8xf32>
    %76 = vector.multi_reduction <add>, %75, %cst_29 [1] : vector<8x8xf32> to vector<8xf32>
    %77 = vector.shape_cast %76 : vector<8xf32> to vector<8x1xf32>
    %78 = tpu.reciprocal %77 {approx = true} : vector<8x1xf32> -> vector<8x1xf32>
    %79 = vector.broadcast %78 : vector<8x1xf32> to vector<8x8xf32>
    %80 = arith.mulf %75, %79 : vector<8x8xf32>
    %81 = arith.truncf %80 : vector<8x8xf32> to vector<8x8xbf16>
    %82 = vector.extract_strided_slice %47 {offsets = [0, 8], sizes = [8, 8], strides = [1, 1]} : vector<8x32xbf16> to vector<8x8xbf16>
    %cst_30 = arith.constant dense<0.000000e+00> : vector<8x8xf32>
    %83 = tpu.matmul %81, %82, %cst_30 {dimension_numbers = #tpu.dot_dimension_numbers<[1], [0], [0], [1], [0, 0, 1, 1], [], []>} : vector<8x8xbf16>, vector<8x8xbf16>, vector<8x8xf32> -> vector<8x8xf32>
    %84 = vector.extract_strided_slice %45 {offsets = [0, 16], sizes = [8, 8], strides = [1, 1]} : vector<8x32xbf16> to vector<8x8xbf16>
    %85 = vector.extract_strided_slice %46 {offsets = [0, 16], sizes = [8, 8], strides = [1, 1]} : vector<8x32xbf16> to vector<8x8xbf16>
    %cst_31 = arith.constant dense<0.000000e+00> : vector<8x8xf32>
    %86 = tpu.matmul %84, %85, %cst_31 {dimension_numbers = #tpu.dot_dimension_numbers<[1], [1], [0], [0], [0, 0, 1, 0], [], []>} : vector<8x8xbf16>, vector<8x8xbf16>, vector<8x8xf32> -> vector<8x8xf32>
    %87 = vector.broadcast %3 : vector<1x8xf32> to vector<8x8xf32>
    %88 = arith.addf %86, %87 : vector<8x8xf32>
    %cst_32 = arith.constant dense<0xFF800000> : vector<8xf32>
    %89 = vector.multi_reduction <maximumf>, %88, %cst_32 [1] : vector<8x8xf32> to vector<8xf32>
    %90 = vector.shape_cast %89 : vector<8xf32> to vector<8x1xf32>
    %91 = vector.broadcast %90 : vector<8x1xf32> to vector<8x8xf32>
    %92 = arith.subf %88, %91 : vector<8x8xf32>
    %93 = math.exp %92 : vector<8x8xf32>
    %cst_33 = arith.constant dense<0.000000e+00> : vector<8xf32>
    %94 = vector.multi_reduction <add>, %93, %cst_33 [1] : vector<8x8xf32> to vector<8xf32>
    %95 = vector.shape_cast %94 : vector<8xf32> to vector<8x1xf32>
    %96 = tpu.reciprocal %95 {approx = true} : vector<8x1xf32> -> vector<8x1xf32>
    %97 = vector.broadcast %96 : vector<8x1xf32> to vector<8x8xf32>
    %98 = arith.mulf %93, %97 : vector<8x8xf32>
    %99 = arith.truncf %98 : vector<8x8xf32> to vector<8x8xbf16>
    %100 = vector.extract_strided_slice %47 {offsets = [0, 16], sizes = [8, 8], strides = [1, 1]} : vector<8x32xbf16> to vector<8x8xbf16>
    %cst_34 = arith.constant dense<0.000000e+00> : vector<8x8xf32>
    %101 = tpu.matmul %99, %100, %cst_34 {dimension_numbers = #tpu.dot_dimension_numbers<[1], [0], [0], [1], [0, 0, 1, 1], [], []>} : vector<8x8xbf16>, vector<8x8xbf16>, vector<8x8xf32> -> vector<8x8xf32>
    %102 = vector.extract_strided_slice %45 {offsets = [0, 24], sizes = [8, 8], strides = [1, 1]} : vector<8x32xbf16> to vector<8x8xbf16>
    %103 = vector.extract_strided_slice %46 {offsets = [0, 24], sizes = [8, 8], strides = [1, 1]} : vector<8x32xbf16> to vector<8x8xbf16>
    %cst_35 = arith.constant dense<0.000000e+00> : vector<8x8xf32>
    %104 = tpu.matmul %102, %103, %cst_35 {dimension_numbers = #tpu.dot_dimension_numbers<[1], [1], [0], [0], [0, 0, 1, 0], [], []>} : vector<8x8xbf16>, vector<8x8xbf16>, vector<8x8xf32> -> vector<8x8xf32>
    %105 = vector.broadcast %3 : vector<1x8xf32> to vector<8x8xf32>
    %106 = arith.addf %104, %105 : vector<8x8xf32>
    %cst_36 = arith.constant dense<0xFF800000> : vector<8xf32>
    %107 = vector.multi_reduction <maximumf>, %106, %cst_36 [1] : vector<8x8xf32> to vector<8xf32>
    %108 = vector.shape_cast %107 : vector<8xf32> to vector<8x1xf32>
    %109 = vector.broadcast %108 : vector<8x1xf32> to vector<8x8xf32>
    %110 = arith.subf %106, %109 : vector<8x8xf32>
    %111 = math.exp %110 : vector<8x8xf32>
    %cst_37 = arith.constant dense<0.000000e+00> : vector<8xf32>
    %112 = vector.multi_reduction <add>, %111, %cst_37 [1] : vector<8x8xf32> to vector<8xf32>
    %113 = vector.shape_cast %112 : vector<8xf32> to vector<8x1xf32>
    %114 = tpu.reciprocal %113 {approx = true} : vector<8x1xf32> -> vector<8x1xf32>
    %115 = vector.broadcast %114 : vector<8x1xf32> to vector<8x8xf32>
    %116 = arith.mulf %111, %115 : vector<8x8xf32>
    %117 = arith.truncf %116 : vector<8x8xf32> to vector<8x8xbf16>
    %118 = vector.extract_strided_slice %47 {offsets = [0, 24], sizes = [8, 8], strides = [1, 1]} : vector<8x32xbf16> to vector<8x8xbf16>
    %cst_38 = arith.constant dense<0.000000e+00> : vector<8x8xf32>
    %119 = tpu.matmul %117, %118, %cst_38 {dimension_numbers = #tpu.dot_dimension_numbers<[1], [0], [0], [1], [0, 0, 1, 1], [], []>} : vector<8x8xbf16>, vector<8x8xbf16>, vector<8x8xf32> -> vector<8x8xf32>
    %120 = tpu.concatenate %65, %83, %101, %119 in 1 : vector<8x8xf32>, vector<8x8xf32>, vector<8x8xf32>, vector<8x8xf32> -> vector<8x32xf32>
    %121 = arith.truncf %120 : vector<8x32xf32> to vector<8x32xbf16>
    %c0_39 = arith.constant 0 : index
    %c0_40 = arith.constant 0 : index
    %122 = vector.load %arg11[%c0_39, %c0_40] : memref<32x32xbf16, #tpu.memory_space<vmem>>, vector<32x32xbf16>
    %cst_41 = arith.constant dense<0.000000e+00> : vector<8x32xf32>
    %123 = tpu.matmul %121, %122, %cst_41 {dimension_numbers = #tpu.dot_dimension_numbers<[1], [0], [0], [1], [0, 0, 1, 1], [], []>} : vector<8x32xbf16>, vector<32x32xbf16>, vector<8x32xf32> -> vector<8x32xf32>
    %c0_42 = arith.constant 0 : index
    %c0_43 = arith.constant 0 : index
    %124 = vector.load %arg12[%c0_42, %c0_43] : memref<1x32xf32, #tpu.memory_space<vmem>>, vector<1x32xf32>
    %125 = vector.shape_cast %124 : vector<1x32xf32> to vector<32xf32>
    %126 = vector.shape_cast %125 : vector<32xf32> to vector<1x32xf32>
    %127 = vector.broadcast %126 : vector<1x32xf32> to vector<8x32xf32>
    %128 = arith.addf %123, %127 : vector<8x32xf32>
    %129 = arith.addf %1, %128 : vector<8x32xf32>
    %c0_44 = arith.constant 0 : index
    %c0_45 = arith.constant 0 : index
    %130 = vector.load %arg13[%c0_44, %c0_45] : memref<1x32xf32, #tpu.memory_space<vmem>>, vector<1x32xf32>
    %131 = vector.shape_cast %130 : vector<1x32xf32> to vector<32xf32>
    %c0_46 = arith.constant 0 : index
    %c0_47 = arith.constant 0 : index
    %132 = vector.load %arg14[%c0_46, %c0_47] : memref<1x32xf32, #tpu.memory_space<vmem>>, vector<1x32xf32>
    %133 = vector.shape_cast %132 : vector<1x32xf32> to vector<32xf32>
    %cst_48 = arith.constant dense<0.000000e+00> : vector<8xf32>
    %134 = vector.multi_reduction <add>, %129, %cst_48 [1] : vector<8x32xf32> to vector<8xf32>
    %135 = vector.shape_cast %134 : vector<8xf32> to vector<8x1xf32>
    %cst_49 = arith.constant 3.200000e+01 : f32
    %136 = vector.broadcast %cst_49 : f32 to vector<8x1xf32>
    %137 = arith.divf %135, %136 : vector<8x1xf32>
    %138 = vector.broadcast %137 : vector<8x1xf32> to vector<8x32xf32>
    %139 = arith.subf %129, %138 : vector<8x32xf32>
    %140 = arith.mulf %139, %139 : vector<8x32xf32>
    %cst_50 = arith.constant dense<0.000000e+00> : vector<8xf32>
    %141 = vector.multi_reduction <add>, %140, %cst_50 [1] : vector<8x32xf32> to vector<8xf32>
    %142 = vector.shape_cast %141 : vector<8xf32> to vector<8x1xf32>
    %cst_51 = arith.constant 3.200000e+01 : f32
    %143 = vector.broadcast %cst_51 : f32 to vector<8x1xf32>
    %144 = arith.divf %142, %143 : vector<8x1xf32>
    %145 = vector.broadcast %137 : vector<8x1xf32> to vector<8x32xf32>
    %146 = arith.subf %129, %145 : vector<8x32xf32>
    %cst_52 = arith.constant 9.99999974E-6 : f32
    %147 = vector.broadcast %cst_52 : f32 to vector<8x1xf32>
    %148 = arith.addf %144, %147 : vector<8x1xf32>
    %149 = math.rsqrt %148 : vector<8x1xf32>
    %150 = vector.broadcast %149 : vector<8x1xf32> to vector<8x32xf32>
    %151 = arith.mulf %146, %150 : vector<8x32xf32>
    %152 = vector.shape_cast %131 : vector<32xf32> to vector<1x32xf32>
    %153 = vector.broadcast %152 : vector<1x32xf32> to vector<8x32xf32>
    %154 = arith.mulf %151, %153 : vector<8x32xf32>
    %155 = vector.shape_cast %133 : vector<32xf32> to vector<1x32xf32>
    %156 = vector.broadcast %155 : vector<1x32xf32> to vector<8x32xf32>
    %157 = arith.addf %154, %156 : vector<8x32xf32>
    %158 = arith.truncf %157 : vector<8x32xf32> to vector<8x32xbf16>
    %c0_53 = arith.constant 0 : index
    %c0_54 = arith.constant 0 : index
    %159 = vector.load %arg15[%c0_53, %c0_54] : memref<32x64xbf16, #tpu.memory_space<vmem>>, vector<32x64xbf16>
    %cst_55 = arith.constant dense<0.000000e+00> : vector<8x64xf32>
    %160 = tpu.matmul %158, %159, %cst_55 {dimension_numbers = #tpu.dot_dimension_numbers<[1], [0], [0], [1], [0, 0, 1, 1], [], []>} : vector<8x32xbf16>, vector<32x64xbf16>, vector<8x64xf32> -> vector<8x64xf32>
    %c0_56 = arith.constant 0 : index
    %c0_57 = arith.constant 0 : index
    %161 = vector.load %arg16[%c0_56, %c0_57] : memref<1x64xf32, #tpu.memory_space<vmem>>, vector<1x64xf32>
    %162 = vector.shape_cast %161 : vector<1x64xf32> to vector<64xf32>
    %163 = vector.shape_cast %162 : vector<64xf32> to vector<1x64xf32>
    %164 = vector.broadcast %163 : vector<1x64xf32> to vector<8x64xf32>
    %165 = arith.addf %160, %164 : vector<8x64xf32>
    %cst_58 = arith.constant 0.000000e+00 : f32
    %166 = vector.broadcast %cst_58 : f32 to vector<8x64xf32>
    %167 = arith.maximumf %165, %166 : vector<8x64xf32>
    %168 = arith.truncf %167 : vector<8x64xf32> to vector<8x64xbf16>
    %c0_59 = arith.constant 0 : index
    %c0_60 = arith.constant 0 : index
    %169 = vector.load %arg17[%c0_59, %c0_60] : memref<64x32xbf16, #tpu.memory_space<vmem>>, vector<64x32xbf16>
    %cst_61 = arith.constant dense<0.000000e+00> : vector<8x32xf32>
    %170 = tpu.matmul %168, %169, %cst_61 {dimension_numbers = #tpu.dot_dimension_numbers<[1], [0], [0], [1], [0, 0, 1, 1], [], []>} : vector<8x64xbf16>, vector<64x32xbf16>, vector<8x32xf32> -> vector<8x32xf32>
    %c0_62 = arith.constant 0 : index
    %c0_63 = arith.constant 0 : index
    %171 = vector.load %arg18[%c0_62, %c0_63] : memref<1x32xf32, #tpu.memory_space<vmem>>, vector<1x32xf32>
    %172 = vector.shape_cast %171 : vector<1x32xf32> to vector<32xf32>
    %173 = vector.shape_cast %172 : vector<32xf32> to vector<1x32xf32>
    %174 = vector.broadcast %173 : vector<1x32xf32> to vector<8x32xf32>
    %175 = arith.addf %170, %174 : vector<8x32xf32>
    %176 = arith.addf %129, %175 : vector<8x32xf32>
    %c0_64 = arith.constant 0 : index
    %c0_65 = arith.constant 0 : index
    %c0_66 = arith.constant 0 : index
    %177 = vector.load %arg19[%c0_64, %c0_65, %c0_66] : memref<1x8x32xf32, #tpu.memory_space<vmem>>, vector<1x8x32xf32>
    %178 = vector.shape_cast %177 : vector<1x8x32xf32> to vector<8x32xf32>
    %179 = vector.shape_cast %176 : vector<8x32xf32> to vector<1x8x32xf32>
    tpu.vector_store %arg19[%c0_64, %c0_65, %c0_66], %179 {strides = array<i32>} : memref<1x8x32xf32, #tpu.memory_space<vmem>>, vector<1x8x32xf32>,
    return
  }
  func.func @transform_0(%arg0: i32, %arg1: i32) -> (i32, i32, i32) {
    %c0_i32 = arith.constant 0 : i32
    %c0_i32_0 = arith.constant 0 : i32
    %c0_i32_1 = arith.constant 0 : i32
    return %arg0, %c0_i32, %c0_i32_0 : i32, i32, i32
  }
  func.func @transform_1(%arg0: i32, %arg1: i32) -> (i32, i32, i32) {
    %c0_i32 = arith.constant 0 : i32
    %c0_i32_0 = arith.constant 0 : i32
    return %arg0, %arg1, %c0_i32 : i32, i32, i32
  }
  func.func @transform_2(%arg0: i32, %arg1: i32) -> (i32, i32, i32) {
    %c0_i32 = arith.constant 0 : i32
    %c0_i32_0 = arith.constant 0 : i32
    %c0_i32_1 = arith.constant 0 : i32
    return %arg0, %c0_i32, %c0_i32_0 : i32, i32, i32
  }
  func.func @transform_3(%arg0: i32, %arg1: i32) -> (i32, i32) {
    %c0_i32 = arith.constant 0 : i32
    %c0_i32_0 = arith.constant 0 : i32
    %c0_i32_1 = arith.constant 0 : i32
    return %c0_i32, %c0_i32_0 : i32, i32
  }
  func.func @transform_4(%arg0: i32, %arg1: i32) -> (i32, i32) {
    %c0_i32 = arith.constant 0 : i32
    %c0_i32_0 = arith.constant 0 : i32
    %c0_i32_1 = arith.constant 0 : i32
    return %c0_i32, %c0_i32_0 : i32, i32
  }
  func.func @transform_5(%arg0: i32, %arg1: i32) -> (i32, i32) {
    %c0_i32 = arith.constant 0 : i32
    %c0_i32_0 = arith.constant 0 : i32
    %c0_i32_1 = arith.constant 0 : i32
    return %c0_i32, %c0_i32_0 : i32, i32
  }
  func.func @transform_6(%arg0: i32, %arg1: i32) -> (i32, i32) {
    %c0_i32 = arith.constant 0 : i32
    %c0_i32_0 = arith.constant 0 : i32
    %c0_i32_1 = arith.constant 0 : i32
    return %c0_i32, %c0_i32_0 : i32, i32
  }
  func.func @transform_7(%arg0: i32, %arg1: i32) -> (i32, i32) {
    %c0_i32 = arith.constant 0 : i32
    %c0_i32_0 = arith.constant 0 : i32
    %c0_i32_1 = arith.constant 0 : i32
    return %c0_i32, %c0_i32_0 : i32, i32
  }
  func.func @transform_8(%arg0: i32, %arg1: i32) -> (i32, i32) {
    %c0_i32 = arith.constant 0 : i32
    %c0_i32_0 = arith.constant 0 : i32
    %c0_i32_1 = arith.constant 0 : i32
    return %c0_i32, %c0_i32_0 : i32, i32
  }
  func.func @transform_9(%arg0: i32, %arg1: i32) -> (i32, i32) {
    %c0_i32 = arith.constant 0 : i32
    %c0_i32_0 = arith.constant 0 : i32
    %c0_i32_1 = arith.constant 0 : i32
    return %c0_i32, %c0_i32_0 : i32, i32
  }
  func.func @transform_10(%arg0: i32, %arg1: i32) -> (i32, i32) {
    %c0_i32 = arith.constant 0 : i32
    %c0_i32_0 = arith.constant 0 : i32
    %c0_i32_1 = arith.constant 0 : i32
    return %c0_i32, %c0_i32_0 : i32, i32
  }
  func.func @transform_11(%arg0: i32, %arg1: i32) -> (i32, i32) {
    %c0_i32 = arith.constant 0 : i32
    %c0_i32_0 = arith.constant 0 : i32
    %c0_i32_1 = arith.constant 0 : i32
    return %c0_i32, %c0_i32_0 : i32, i32
  }
  func.func @transform_12(%arg0: i32, %arg1: i32) -> (i32, i32) {
    %c0_i32 = arith.constant 0 : i32
    %c0_i32_0 = arith.constant 0 : i32
    %c0_i32_1 = arith.constant 0 : i32
    return %c0_i32, %c0_i32_0 : i32, i32
  }
  func.func @transform_13(%arg0: i32, %arg1: i32) -> (i32, i32) {
    %c0_i32 = arith.constant 0 : i32
    %c0_i32_0 = arith.constant 0 : i32
    %c0_i32_1 = arith.constant 0 : i32
    return %c0_i32, %c0_i32_0 : i32, i32
  }
  func.func @transform_14(%arg0: i32, %arg1: i32) -> (i32, i32) {
    %c0_i32 = arith.constant 0 : i32
    %c0_i32_0 = arith.constant 0 : i32
    %c0_i32_1 = arith.constant 0 : i32
    return %c0_i32, %c0_i32_0 : i32, i32
  }
  func.func @transform_15(%arg0: i32, %arg1: i32) -> (i32, i32) {
    %c0_i32 = arith.constant 0 : i32
    %c0_i32_0 = arith.constant 0 : i32
    %c0_i32_1 = arith.constant 0 : i32
    return %c0_i32, %c0_i32_0 : i32, i32
  }
  func.func @transform_16(%arg0: i32, %arg1: i32) -> (i32, i32) {
    %c0_i32 = arith.constant 0 : i32
    %c0_i32_0 = arith.constant 0 : i32
    %c0_i32_1 = arith.constant 0 : i32
    return %c0_i32, %c0_i32_0 : i32, i32
  }
  func.func @transform_17(%arg0: i32, %arg1: i32) -> (i32, i32, i32) {
    %c0_i32 = arith.constant 0 : i32
    %c0_i32_0 = arith.constant 0 : i32
    return %arg0, %arg1, %c0_i32 : i32, i32, i32
  }
}

</mosaic_0001>

<bundles_post_ra>
// kernel: tpu_custom_call.1
= control target key start
LH: loop header
LB: loop body
LE: loop exit
PB: predicated region body
PF: predicated region fallthrough
CT: control target
= control target key end

     0   :  { %s2234_s0 = inlined_call_operand.hbm [shape: bf16[2,8,32], index: 0, kind: input, shape index: {}]   ;;  %s2235_s1 = inlined_call_operand.vmem [shape: f32[2,8,32], index: 1, kind: input, shape index: {}]   ;;  %s2236_s2 = inlined_call_operand.hbm [shape: f32[2,1,8], index: 2, kind: input, shape index: {}]   ;;  %s2237_s3 = inlined_call_operand.vmem [shape: f32[1,32], index: 3, kind: input, shape index: {}]   ;;  %s2238_s4 = inlined_call_operand.vmem [shape: f32[1,32], index: 4, kind: input, shape index: {}]   ;;  %s2239_s5 = inlined_call_operand.vmem [shape: bf16[32,32], index: 5, kind: input, shape index: {}]   ;;  %s2240_s6 = inlined_call_operand.vmem [shape: f32[1,32], index: 6, kind: input, shape index: {}]   ;;  %s2241_s7 = inlined_call_operand.vmem [shape: bf16[32,64], index: 7, kind: input, shape index: {}]   ;;  %s2242_s8 = inlined_call_operand.vmem [shape: f32[1,64], index: 8, kind: input, shape index: {}]   ;;  %s2243_s9 = inlined_call_operand.hbm [shape: bf16[32,32], index: 9, kind: input, shape index: {}]   ;;  %s2244_s10 = inlined_call_operand.vmem [shape: f32[1,32], index: 10, kind: input, shape index: {}]   ;;  %s2245_s11 = inlined_call_operand.vmem [shape: f32[1,32], index: 11, kind: input, shape index: {}]   ;;  %s2246_s12 = inlined_call_operand.vmem [shape: f32[1,32], index: 12, kind: input, shape index: {}]   ;;  %s2247_s13 = inlined_call_operand.hbm [shape: bf16[32,64], index: 13, kind: input, shape index: {}]   ;;  %s2248_s14 = inlined_call_operand.vmem [shape: f32[1,64], index: 14, kind: input, shape index: {}]   ;;  %s2249_s15 = inlined_call_operand.vmem [shape: bf16[64,32], index: 15, kind: input, shape index: {}]   ;;  %s2250_s16 = inlined_call_operand.vmem [shape: f32[1,32], index: 16, kind: input, shape index: {}]   ;;  %s2251_s17 = inlined_call_operand.hbm [shape: f32[2,8,32], index: 17, kind: output, shape index: {}]  }
   0x1   :  { %2260 = sst [smem:[#allocation23_spill]] %s2234_s0 }
   0x2   :  { %2261 = sst [smem:[#allocation24_spill]] %s2235_s1 }
   0x3   :  { %2262 = sst [smem:[#allocation25_spill]] %s2240_s6 }
   0x4   :  { %2263 = sst [smem:[#allocation26_spill]] %s2242_s8 }
   0x5   :  { %2264 = sst [smem:[#allocation27_spill]] %s2243_s9 }
   0x6   :  { %2265 = sst [smem:[#allocation28_spill]] %s2244_s10 }
   0x7   :  { %2266 = sst [smem:[#allocation29_spill]] %s2245_s11 }
   0x8   :  { %2267 = sst [smem:[#allocation30_spill]] %s2246_s12 }
   0x9   :  { %2268 = sst [smem:[#allocation31_spill]] %s2247_s13 }
   0xa   :  { %2269 = sst [smem:[#allocation32_spill]] %s2248_s14 }
   0xb   :  { %2270 = sst [smem:[#allocation33_spill]] %s2249_s15 }
   0xc   :  { %2271 = sst [smem:[#allocation34_spill]] %s2250_s16 }
   0xd   :  { %2272 = sst [smem:[#allocation35_spill]] %s2251_s17 }
   0xe   :  { %22 = vsyncpa [#allocation4], 0 }
   0xf   :  { %24 = vsyncpa [#allocation4 + $0x1], 0 }
  0x10   :  { %25 = vsyncpa [#allocation7], 0 }
  0x11   :  { %27 = vsyncpa [#allocation7 + $0x1], 0 }
  0x12   :  { %28 = vsyncpa [#allocation10], 0 }
  0x13   :  { %29 = vsyncpa [#allocation5], 0 }
  0x14   :  { %31 = vsyncpa [#allocation5 + $0x1], 0  ;;  %s1951_s24 = smov 0   ;;  %s1953_s25 = smov 0  }
  0x15   :  { %s1955_s26 = smov 0   ;;  %s1957_s27 = smov 0  }
  0x16   :  { %s1959_s28 = smov 0   ;;  %s1961_s29 = smov 0  }
  0x17 LB: > { %2273 = sst [smem:[#allocation17_spill]] %s1824_s24  ;;  %s1982_s0 = sadd.s32 4294967295, %s1844_s29   ;;  %s1844_s29 = sphi %s1961_s29, %s37_s29   ;;  %s1840_s28 = sphi %s1959_s28, %s2307_s28   ;;  %s1836_s27 = sphi %s1957_s27, %s2306_s27   ;;  %s1832_s26 = sphi %s1955_s26, %s2302_s26   ;;  %s1828_s25 = sphi %s1953_s25, %s2305_s25   ;;  %s1824_s24 = sphi %s1951_s24, %s2304_s24  }
  0x18   : > { %2274 = sst [smem:[#allocation18_spill]] %s1832_s26  ;;  %p1406_p0 = scmp.ge.s32.totalorder %s1844_s29, 1 }
  0x19   : > { %p70_p1 = scmp.eq.s32.totalorder %s1982_s0, 0  ;;  %p456_p2 = scmp.lt.s32.totalorder %s1844_s29, 3 }
  0x1a   : > { %s2275_s9 = sld [smem:[#allocation27_spill]]  ;;  %s1846_s20 = smov [#allocation8]  }
  0x1b   : > { %p1990_p3 = pnand %p1406_p0, %p456_p2  ;;  %s487_s21 = sshll.u32 %s1846_s20, 4  ;;  %s488_s21 = int_to_ptr.vmem [resolvable:$true] %s487_s21 }
  0x1c   : > { %p1409_p6 = scmp.ge.s32.totalorder %s1844_s29, 2  ;;  %s2277_s13 = sld [smem:[#allocation31_spill]] }
  0x1d   : > { %p1509_p4 = pneg %p1990_p3  ;;  %s1847_s18 = smov 64  }
  0x1e   : > { %s1849_s20 = smov [#allocation9]   ;;  %s1405_s16 = sadd.s32 4294967294, %s1844_s29  }
  0x1f   : > { %p1510_p5 = pnand %p1509_p4, %p70_p1  ;;  %s510_s17 = sshll.u32 %s1849_s20, 4  ;;  %s511_s17 = int_to_ptr.vmem [resolvable:$true] %s510_s17 }
  0x20   : > { %s485_s19 = sshll.u32 %s2275_s9, 4  ;;  %s1848_s9 = smov 4   ;;  %s486_s19 = int_to_ptr.hbm [resolvable:$true] %s485_s19 }
  0x21   : > { %1512 = dma.hbm_to_vmem [thread:$0]  (!%p1510_p5), %s486_s19, 256, %s488_s21, [#allocation7], %s1847_s18, %s1847_s18, %s1848_s9  }
  0x22   : > { %s508_s30 = sshll.u32 %s2277_s13, 4  ;;  %s49_s14 = sadd.s32 1, %s1840_s28  ;;  %s509_s30 = int_to_ptr.hbm [resolvable:$true] %s508_s30 }
  0x23   : > { %1515 = dma.hbm_to_vmem [thread:$0]  (!%p1510_p5), %s509_s30, 256, %s511_s17, [#allocation10], %s1847_s18, %s1847_s18, %s1848_s9  }
  0x24   : > { %p51_p7 = scmp.ge.s32.totalorder %s49_s14, 2  ;;  %s56_s22 = sadd.s32 1, %s1832_s26 }
  0x25   : > { %p63_p8 = scmp.ne.s32.totalorder %s1832_s26, %s1828_s25  ;;  %p64_p9 = scmp.eq.s32.totalorder %s1844_s29, 0 }
  0x26   : > { %s2309_s14 = smov (%p51_p7, %s49_s14), 0  ;;  %p69_p11 = scmp.ne.s32.totalorder %s1828_s25, %s1824_s24 }
  0x27   : > { %2278 = sst [smem:[#allocation19_spill]] %s2309_s14  ;;  %p2010_p10 = por %p64_p9, %p63_p8 }
  0x28   : > { %s53_s21 = ssub.s32 %s1840_s28, %s2309_s14  ;;  %p443_p12 = scmp.eq.s32.totalorder %s1982_s0, 1 }
  0x29   : > { %p54_p13 = scmp.eq.s32.totalorder %s53_s21, 0  ;;  %p2021_p0 = por %p70_p1, %p69_p11 }
  0x2a   : > { %p2025_p2 = por %p443_p12, %p63_p8  ;;  %p449_p4 = scmp.eq.s32.totalorder %s1405_s16, 1 }
  0x2b   : > { %s2030_s23 = scalar_select %p54_p13, %s1832_s26, %s56_s22  }
  0x2c   : > { %s2281_s17 = scalar_select %p2025_p2, 1, 0 }
  0x2d   : > { %2283 = sst [smem:[#allocation21_spill]] %s2030_s23  ;;  %p2032_p5 = por %p449_p4, %p69_p11 }
  0x2e   : > { %2282 = sst [smem:[#allocation20_spill]] %s2281_s17  ;;  %p1529_p7 = scmp.lt.s32.totalorder %s1844_s29, 2 }
  0x2f   : > { %s2284_s30 = scalar_select %p2032_p5, 1, 0 }
  0x30   : > { %s533_s18 = sand.u32 1, %s1832_s26   ;;  %s1411_s20 = sshll.u32 %s1840_s28, 2 }
  0x31   : > { %2285 = sst [smem:[#allocation22_spill]] %s2284_s30  ;;  %s1410_s21 = sshll.u32 %s533_s18, 2 }
  0x32   : > { %s2286_s24 = sld [smem:[#allocation23_spill]]  ;;  %s537_s15 = scalar_lea.vmem [#allocation3], %s1410_s21 }
  0x33   : > { %s545_s10 = sshll.u32 %s537_s15, 4  ;;  %p1517_p8 = pnand %p1529_p7, %p2010_p10  ;;  %s546_s10 = int_to_ptr.vmem [resolvable:$true] %s545_s10 }
  0x34   : > { %s562_s16 = sand.u32 1, %s1844_s29   ;;  %s568_s30 = scalar_lea.hbm %s2236_s2, %s1840_s28 }
  0x35   : > { %s534_s17 = scalar_lea.sflag [#allocation4], %s533_s18  ;;  %s570_s26 = sshll.u32 %s568_s30, 4  ;;  %s571_s26 = int_to_ptr.hbm [resolvable:$true] %s570_s26 }
  0x36   : > { %s565_s6 = scalar_lea.vmem [#allocation6], %s533_s18  ;;  %s563_s13 = scalar_lea.sflag [#allocation7], %s562_s16 }
  0x37   : > { %s572_s8 = sshll.u32 %s565_s6, 4  ;;  %581 = sbr.rel (%p1990_p3) target bundleno = 2224 (0x8b0), region = 88  ;;  %s573_s8 = int_to_ptr.vmem [resolvable:$true] %s572_s8 }
  0x38   : > { %s541_s12 = scalar_lea.hbm %s2286_s24, %s1411_s20 }
  0x39   : > { %s543_s11 = sshll.u32 %s541_s12, 4  ;;  %s2052_s12 = sand.u32 (!%p1990_p3), 1, %s1828_s25   ;;  %s544_s11 = int_to_ptr.hbm [resolvable:$true] %s543_s11 }
  0x3a   : > { %1519 = dma.hbm_to_vmem [thread:$0]  (!%p1517_p8), %s544_s11, 64, %s546_s10, %s534_s17  }
  0x3b   : > { %1522 = dma.hbm_to_vmem [thread:$0]  (!%p1517_p8), %s571_s26, 16, %s573_s8, %s563_s13  }
  0x3c   : > { %s1413_s14 = sshll.u32 %s2052_s12, 2  ;;  %s584_s15 = scalar_lea.sflag [#allocation4], %s2052_s12 }
  0x3d   : > { %s587_s24 = scalar_lea.vmem [#allocation3], %s1413_s14 }
  0x3e   : > { %1803 = dma.done.wait (%p2021_p0), %s584_s15, 64  }
  0x3f   : > { %1805 = vsyncadd (%p2021_p0), %s584_s15, 4294967232  ;;  %s593_s6 = sand.u32 1, %s1982_s0   ;;  %s596_s10 = scalar_lea.vmem [#allocation6], %s2052_s12 }
  0x40   : > { %s594_s8 = scalar_lea.sflag [#allocation7], %s593_s6 }
  0x41   : > { %1807 = dma.done.wait (%p2021_p0), %s594_s8, 16  }
  0x42   : > { %1809 = vsyncadd (%p2021_p0), %s594_s8, 4294967280 }
  0x43   : > { %1811 = dma.done.wait (%p70_p1), [#allocation7], 256  }
  0x44   : > { %1813 = vsyncadd (%p70_p1), [#allocation7], 4294967040 }
  0x45   : > { %1815 = dma.done.wait (%p70_p1), [#allocation10], 256  }
  0x46   : > { %1817 = vsyncadd (%p70_p1), [#allocation10], 4294967040  ;;  %p669_p3 = scmp.lt.s32.totalorder %s1836_s27, 1  ;;  %v685_v0 = vld [vmem:[%s587_s24] sm:$0xf]  ;;  %vm687_vm0 = vcmask 261120  }
  0x47   : > { %v686_v1 = vunpack.c.l.bf16 %v685_v0  ;;  %s2287_s9 = sld [smem:[#allocation24_spill]]  ;;  %v1850_v5 = vmov 32.0   ;;  %v1484_v22 = vld [vmem:[%s2241_s7 + $0x8] sm:$0xff]  ;;  %v1483_v23 = vld [vmem:[%s2241_s7] sm:$0xff]  ;;  %vm763_vm8 = vcmask 519168   ;;  %vm846_vm9 = vcmask 64512  }
  0x48   : > { %s670_s11 = scalar_select %p669_p3, %s1836_s27, 1  ;;  %1606 = vrcp.f32 %v1850_v5  ;;  %755 = vmatpush.bf16.msra.mxu0 %v1484_v22  ;;  %v1486_v24 = vld [vmem:[%s2239_s5 + $0x8] sm:$0xff]  ;;  %v1485_v26 = vld [vmem:[%s2239_s5] sm:$0xff]  ;;  %vm886_vm10 = vcmask 1043456   ;;  %vm1087_vm11 = vcmask 130048   ;;  %vm1089_vm12 = vcmask 195584  }
  0x49   : > { %v688_v2 = vsel %vm687_vm0, %v686_v1, 0.0  ;;  %833 = vmatpush.bf16.msra.mxu1 %v1486_v24  ;;  %v1596_v40 = vld [vmem:[%s2237_s3] ss:$0 sm:$0xff]  ;;  %s2289_s19 = sld [smem:[#allocation25_spill]]  ;;  %s1853_s0 = smov 112  }
  0x4a   : > { %s1417_s26 = sshll.u32 %s670_s11, 3  ;;  %689 = vadd.xlane.f32.xlu0 %v688_v2  ;;  %v1597_v44 = vld [vmem:[%s2238_s4] ss:$0 sm:$0xff]  ;;  %s2288_s11 = sld [smem:[#allocation26_spill]] }
  0x4b   : > { %s1854_s23 = smov 104   ;;  %s1856_s30 = smov 80  }
  0x4c   : > { %756 = vmatpush.bf16.msra.mxu0 %v1483_v23  ;;  %s1857_s18 = smov 72   ;;  %s1858_s20 = smov 16  }
  0x4d   : > { %s675_s17 = scalar_lea.vmem %s2287_s9, %s1417_s26  ;;  %834 = vmatpush.bf16.msra.mxu1 %v1485_v26  ;;  %s1851_s9 = smov 96  }
  0x4e   : > { %v2080_v3 = vld [vmem:[%s675_s17] sm:$0xff]  ;;  %v1607_v6 = vpop.eup %1606  ;;  %s1852_s17 = smov 120   ;;  %s1859_s21 = smov 8  }
  0x4f   : > { %v766_v4 = vsel %vm687_vm0, %v2080_v3, 0.0  ;;  %v692_v7 = vmul.f32 32.0, %v1607_v6  ;;  %vm696_vm1 = vweird.f32 %v1607_v6  ;;  %v1599_v60 = vld [vmem:[%s2289_s19] ss:$0 sm:$0xff]  ;;  %s1860_s16 = smov 24   ;;  %s2290_s14 = sld [smem:[#allocation28_spill]] }
  0x50   : > { %v1598_v56 = vld [vmem:[%s2288_s11] ss:$0 sm:$0xff]  ;;  %s2291_s6 = sld [smem:[#allocation33_spill]]  ;;  %s1416_s22 = sshll.u32 %s2052_s12, 3 }
  0x51   : > { %v693_v8 = vsub.f32 1.0, %v692_v7  ;;  %s2292_s19 = sld [smem:[#allocation29_spill]]  ;;  %s1480_s13 = sshll.u32 %s1836_s27, 3 }
  0x52   : > { %767 = vadd.xlane.f32.xlu0 %v766_v4  ;;  %s2295_s24 = sld [smem:[#allocation34_spill]]  ;;  %s1256_s27 = scalar_lea.sflag [#allocation5], %s2052_s12 }
  0x53   : > { %v694_v9 = vmul.f32 %v1607_v6, %v693_v8  ;;  %s2296_s26 = sld [smem:[#allocation35_spill]] }
  0x55   : > { %v695_v10 = vadd.f32 %v1607_v6, %v694_v9 }
  0x57   : > { %v2084_v11 = vsel %vm696_vm1, %v1607_v6, %v695_v10  ;;  %vm1236_vm1 = vcmask 523264  }
  0x59   : > { %s2297_s1 = smov %s2296_s26 }
  0xbd   : > { %v690_v12 = vpop.xlane.xlu0 %689 }
  0xbe   : > { %v698_v13 = vmul.f32 %v2084_v11, %v690_v12 }
  0xc0   : > { %v699_v14 = vsub.f32 %v686_v1, %v698_v13 }
  0xc2   : > { %v700_v15 = vmul.f32 %v699_v14, %v699_v14 }
  0xc4   : > { %v701_v16 = vsel %vm687_vm0, %v700_v15, 0.0 }
  0xc5   : > { %702 = vadd.xlane.f32.xlu1 %v701_v16  ;;  %v768_v17 = vpop.xlane.xlu0 %767 }
  0xc6   : > { %v776_v18 = vmul.f32 %v768_v17, %v2084_v11 }
  0xc8   : > { %v777_v19 = vsub.f32 %v2080_v3, %v776_v18  ;;  %v1600_v18 = vld [vmem:[%s596_s10] ss:$0 sm:$0xff]  ;;  %s1855_s10 = smov 88  }
  0xca   : > { %v778_v20 = vmul.f32 %v777_v19, %v777_v19 }
  0xcc   : > { %v779_v21 = vsel %vm687_vm0, %v778_v20, 0.0 }
  0xcd   : > { %780 = vadd.xlane.f32.xlu1 %v779_v21 }
 0x138   : > { %v703_v25 = vpop.xlane.xlu1 %702 }
 0x139   : > { %v704_v27 = vmul.f32 %v703_v25, %v2084_v11 }
 0x13b   : > { %v705_v28 = vadd.f32 1e-05, %v704_v27 }
 0x13d   : > { %1608 = vrsqrt.f32 %v705_v28  ;;  %vm712_vm3 = vweird.f32 %v705_v28 }
 0x140   : > { %v781_v29 = vpop.xlane.xlu1 %780 }
 0x141   : > { %v782_v30 = vmul.f32 %v781_v29, %v2084_v11 }
 0x143   : > { %v1609_v31 = vpop.eup %1608  ;;  %v783_v32 = vadd.f32 1e-05, %v782_v30 }
 0x144   : > { %v707_v33 = vmul.f32 %v1609_v31, %v705_v28  ;;  %vm713_vm2 = vweird.f32 %v1609_v31 }
 0x145   : > { %1610 = vrsqrt.f32 %v783_v32  ;;  %vm714_vm4 = vmor %vm712_vm3, %vm713_vm2  ;;  %vm790_vm5 = vweird.f32 %v783_v32 }
 0x146   : > { %v708_v34 = vmul.f32 %v1609_v31, %v707_v33 }
 0x148   : > { %v709_v35 = vmul.f32 0.5, %v708_v34 }
 0x14a   : > { %v710_v36 = vsub.f32 1.5, %v709_v35 }
 0x14b   : > { %v1611_v37 = vpop.eup %1610 }
 0x14c   : > { %v711_v38 = vmul.f32 %v1609_v31, %v710_v36  ;;  %v785_v39 = vmul.f32 %v1611_v37, %v783_v32  ;;  %vm791_vm6 = vweird.f32 %v1611_v37 }
 0x14d   : > { %vm792_vm7 = vmor %vm790_vm5, %vm791_vm6 }
 0x14e   : > { %v715_v41 = vsel %vm714_vm4, %v1609_v31, %v711_v38  ;;  %v786_v42 = vmul.f32 %v1611_v37, %v785_v39 }
 0x14f   : > { %v716_v43 = vmul.f32 %v715_v41, %v699_v14 }
 0x150   : > { %v787_v45 = vmul.f32 0.5, %v786_v42 }
 0x151   : > { %v720_v46 = vmul.f32 %v1596_v40, %v716_v43 }
 0x152   : > { %v788_v47 = vsub.f32 1.5, %v787_v45 }
 0x153   : > { %v724_v48 = vadd.f32 %v1597_v44, %v720_v46 }
 0x154   : > { %v789_v49 = vmul.f32 %v1611_v37, %v788_v47 }
 0x155   : > { %v725_v50 = vpack.c.bf16 %v724_v48, %v724_v48 }
 0x156   : > { %v793_v51 = vsel %vm792_vm7, %v1611_v37, %v789_v49 }
 0x157   : > { %1426 = vmatmul.msk.bf16.vlgmr.msra.gmra.mxu0 %vm687_vm0, %v725_v50  ;;  %v794_v52 = vmul.f32 %v793_v51, %v777_v19 }
 0x159   : > { %v798_v53 = vmul.f32 %v1596_v40, %v794_v52 }
 0x15b   : > { %v802_v54 = vadd.f32 %v1597_v44, %v798_v53 }
 0x15d   : > { %v803_v55 = vpack.c.bf16 %v802_v54, %v802_v54 }
 0x15f   : > { %1435 = vmatmul.msk.bf16.vlgmr.msra.gmra.mxu1 %vm687_vm0, %v803_v55 }
 0x1d4   : > { %v758_v57 = vpop.f32.mrf.mxu0 }
 0x1d5   : > { %v759_v58 = vadd.f32 %v1598_v56, %v758_v57 }
 0x1d7   : > { %v762_v59 = vpack.c.bf16 %v759_v58, %v759_v58 }
 0x1d9   : > { %764 = vst.msk [vmem:[#allocation2] sm:$0xf] %vm763_vm8, %v762_v59 }
 0x1dc   : > { %v760_v61 = vpop.f32.mrf.mxu0  ;;  %v836_v62 = vpop.f32.mrf.mxu1 }
 0x1dd   : > { %v837_v63 = vadd.f32 %v1599_v60, %v836_v62 }
 0x1df   : > { %v840_v0 = vmul.f32 0.35355338, %v837_v63 }
 0x1e0   : > { %v842_v1 = vld [vmem:[#allocation2] sm:$0xf] }
 0x1e1   : > { %v851_v2 = vsel %vm846_vm9, %v842_v1, 0  ;;  %v879_v4 = vunpack.c.l.b16 %v842_v1  ;;  %v841_v5 = vpack.c.bf16 %v840_v0, %v840_v0 }
 0x1e2   : > { %860 = vmatpush.bf16.xpose.msra.mxu2 %v851_v2 }
 0x1e3   : > { %v2120_v6 = vpack.c.b16 %v879_v4, %v879_v4  ;;  %v904_v8 = vunpack.c.l.b16 %v841_v5 }
 0x1e4   : > { %v838_v7 = vpop.f32.mrf.mxu1 }
 0x1e5   : > { %881 = vrot.lane.b32.xlu0 %v2120_v6, %s1851_s9  ;;  %908 = vrot.lane.b32.xlu1 %v2120_v6, %s1852_s17  ;;  %v905_v9 = vpack.c.b16 %v904_v8, %v904_v8  ;;  %s1267_s9 = scalar_lea.hbm %s2296_s26, %s1480_s13 }
 0x1e9   : > { %1436 = vmatmul.msk.bf16.vlgmr.msra.gmra.mxu2 %vm846_vm9, %v841_v5 }
 0x1ed   : > { %964 = vrot.lane.b32.xlu0 %v2120_v6, %s1853_s0  ;;  %962 = vrot.lane.b32.xlu1 %v905_v9, %s1853_s0  ;;  %s2293_s0 = sld [smem:[#allocation30_spill]] }
 0x1f5   : > { %1018 = vrot.lane.b32.xlu0 %v905_v9, %s1854_s23 }
 0x257   : > { %v909_v10 = vpop.permute.xlu1 %908  ;;  %v882_v12 = vpop.permute.xlu0 %881 }
 0x258   : > { %v888_v13 = vsel %vm886_vm10, %v882_v12, 0  ;;  %v914_v14 = vsel %vm846_vm9, %v909_v10, 0 }
 0x259   : > { %897 = vmatpush.bf16.msra.mxu3 %v888_v13 }
 0x25d   : > { %923 = vmatpush.bf16.xpose.msrb.mxu3 %v914_v14 }
 0x25f   : > { %v965_v15 = vpop.permute.xlu0 %964  ;;  %v963_v17 = vpop.permute.xlu1 %962 }
 0x260   : > { %v970_v16 = vsel %vm846_vm9, %v965_v15, 0 }
 0x261   : > { %979 = vmatpush.bf16.xpose.msrb.mxu1 %v970_v16 }
 0x267   : > { %v1019_v42 = vpop.permute.xlu0 %1018 }
 0x268   : > { %1440 = vmatmul.msk.bf16.vlgmr.msrb.gmra.mxu1 %vm846_vm9, %v963_v17 }
 0x26c   : > { %v862_v19 = vpop.f32.mrf.mxu2 }
 0x26d   : > { %v863_v20 = vadd.f32 %v1600_v18, %v862_v19 }
 0x26f   : > { %v866_v21 = vsel %vm846_vm9, %v863_v20, -inf }
 0x270   : > { %867 = vmax.xlane.f32.xlu2 %v866_v21 }
 0x274   : > { %v864_v22 = vpop.f32.mrf.mxu2 }
 0x288   : > { %906 = vrot.lane.b32.xlu2 %v905_v9, %s1852_s17  ;;  %s668_s17 = scalar_lea.vmem [#allocation11], %s1416_s22 }
 0x2e3   : > { %v868_v23 = vpop.xlane.xlu2 %867 }
 0x2e4   : > { %v869_v24 = vsub.f32 %v863_v20, %v868_v23 }
 0x2e5   : > { %v981_v25 = vpop.f32.mrf.mxu1 }
 0x2e6   : > { %v870_v26 = vmul.f32 1.442695, %v869_v24  ;;  %v982_v27 = vadd.f32 %v1600_v18, %v981_v25 }
 0x2e8   : > { %1612 = vpow2.f32 %v870_v26  ;;  %v985_v28 = vsel %vm846_vm9, %v982_v27, -inf }
 0x2e9   : > { %986 = vmax.xlane.f32.xlu1 %v985_v28  ;;  %v1487_v28 = vld [vmem:[#allocation8] sm:$0xff] }
 0x2eb   : > { %v907_v32 = vpop.permute.xlu2 %906 }
 0x2ed   : > { %v983_v29 = vpop.f32.mrf.mxu1 }
 0x2ee   : > { %v1613_v30 = vpop.eup %1612 }
 0x2ef   : > { %v872_v31 = vsel %vm846_vm9, %v1613_v30, 0.0 }
 0x2f0   : > { %873 = vadd.xlane.f32.xlu2 %v872_v31 }
 0x302   : > { %941 = vrot.lane.b32.xlu1 %v2120_v6, %s1855_s10 }
 0x308   : > { %1020 = vrot.lane.b32.xlu2 %v2120_v6, %s1854_s23  ;;  %s1271_s23 = sshll.u32 %s1267_s9, 4  ;;  %s1272_s23 = int_to_ptr.hbm [resolvable:$true] %s1271_s23 }
 0x309   : > { %s1764_s10 = sshra.s32 %s1272_s23, 4  ;;  %s1765_s10 = int_to_ptr.hbm [resolvable:$true] %s1764_s10 }
 0x30a   : > { %p1771_p11 = scmp.lt.s32.totalorder %s1765_s10, %s2297_s1 }
 0x35c   : > { %v987_v36 = vpop.xlane.xlu1 %986 }
 0x35d   : > { %v988_v49 = vsub.f32 %v982_v27, %v987_v36  ;;  %v1488_v27 = vld [vmem:[#allocation8 + $0x8] sm:$0xff]  ;;  %v1601_v36 = vld [vmem:[%s2290_s14] ss:$0 sm:$0xff] }
 0x35e   : > { %1121 = vmatpush.bf16.msra.mxu1 %v1488_v27 }
 0x35f   : > { %v989_v50 = vmul.f32 1.442695, %v988_v49 }
 0x362   : > { %1122 = vmatpush.bf16.msra.mxu1 %v1487_v28 }
 0x363   : > { %v874_v33 = vpop.xlane.xlu2 %873 }
 0x364   : > { %1614 = vrcp.f32 %v874_v33 }
 0x365   : > { %1616 = vpow2.f32 %v989_v50 }
 0x36a   : > { %v1615_v34 = vpop.eup %1614 }
 0x36b   : > { %v876_v35 = vmul.f32 %v1615_v34, %v1613_v30  ;;  %v1021_v37 = vpop.permute.xlu2 %1020  ;;  %v1617_v54 = vpop.eup %1616 }
 0x36c   : > { %v1026_v39 = vsel %vm846_vm9, %v1021_v37, 0  ;;  %v991_v56 = vsel %vm846_vm9, %v1617_v54, 0.0 }
 0x36d   : > { %v877_v38 = vpack.c.bf16 %v876_v35, %v876_v35 }
 0x36f   : > { %1437 = vmatmul.msk.bf16.vlgmr.msra.gmra.mxu3 %vm846_vm9, %v877_v38 }
 0x370   : > { %1035 = vmatpush.bf16.xpose.msra.mxu3 %v1026_v39 }
 0x374   : > { %v942_v40 = vpop.permute.xlu1 %941 }
 0x375   : > { %v947_v41 = vsel %vm886_vm10, %v942_v40, 0 }
 0x376   : > { %956 = vmatpush.bf16.msrb.mxu0 %v947_v41 }
 0x37f   : > { %1438 = vmatmul.msk.bf16.vlgmr.msrb.gmra.mxu3 %vm846_vm9, %v907_v32 }
 0x38f   : > { %1442 = vmatmul.msk.bf16.vlgmr.msra.gmra.mxu3 %vm846_vm9, %v1019_v42 }
 0x3f2   : > { %v2144_v43 = vpop.f32.mrf.mxu3 }
 0x3fa   : > { %v901_v44 = vpop.f32.mrf.mxu3 }
 0x402   : > { %v925_v45 = vpop.f32.mrf.mxu3 }
 0x403   : > { %v926_v46 = vadd.f32 %v1600_v18, %v925_v45 }
 0x405   : > { %v929_v47 = vsel %vm846_vm9, %v926_v46, -inf }
 0x406   : > { %930 = vmax.xlane.f32.xlu2 %v929_v47  ;;  %v1490_v47 = vld [vmem:[#allocation9 + $0x8] sm:$0xff] }
 0x40a   : > { %v927_v48 = vpop.f32.mrf.mxu3 }
 0x40b   : > { %v1489_v48 = vld [vmem:[#allocation9] sm:$0xff] }
 0x412   : > { %v1037_v51 = vpop.f32.mrf.mxu3 }
 0x413   : > { %v1038_v52 = vadd.f32 %v1600_v18, %v1037_v51  ;;  %v1493_v51 = vld [vmem:[%s2291_s6 + $0x10] sm:$0xff] }
 0x415   : > { %v1041_v53 = vsel %vm846_vm9, %v1038_v52, -inf }
 0x416   : > { %1042 = vmax.xlane.f32.xlu0 %v1041_v53 }
 0x41a   : > { %v1039_v55 = vpop.f32.mrf.mxu3 }
 0x41e   : > { %992 = vadd.xlane.f32.xlu0 %v991_v56 }
 0x432   : > { %997 = vrot.lane.b32.xlu0 %v2120_v6, %s1856_s30  ;;  %s1766_s30 = scalar_lea.hbm %s1765_s10, 8 }
 0x433   : > { %p1767_p1 = scmp.ne.s32.totalorder %s1765_s10, %s1766_s30 }
 0x435   : > { %p1768_p9 = pnand %p1767_p1, %p2025_p2 }
 0x437   : > { %p1769_p10 = pneg %p1768_p9 }
 0x479   : > { %v931_v57 = vpop.xlane.xlu2 %930 }
 0x47a   : > { %v932_v58 = vsub.f32 %v926_v46, %v931_v57 }
 0x47c   : > { %v933_v59 = vmul.f32 1.442695, %v932_v58 }
 0x47e   : > { %1618 = vpow2.f32 %v933_v59 }
 0x484   : > { %v1619_v60 = vpop.eup %1618 }
 0x485   : > { %v935_v61 = vsel %vm846_vm9, %v1619_v60, 0.0 }
 0x486   : > { %936 = vadd.xlane.f32.xlu2 %v935_v61  ;;  %v1603_v61 = vld [vmem:[%s2293_s0] ss:$0 sm:$0xff]  ;;  %s1269_s0 = sshll.u32 %s668_s17, 4  ;;  %s1270_s0 = int_to_ptr.vmem [resolvable:$true] %s1269_s0 }
 0x489   : > { %v1043_v62 = vpop.xlane.xlu0 %1042 }
 0x48a   : > { %v1044_v63 = vsub.f32 %v1038_v52, %v1043_v62 }
 0x48c   : > { %v1045_v0 = vmul.f32 1.442695, %v1044_v63 }
 0x48e   : > { %1620 = vpow2.f32 %v1045_v0 }
 0x491   : > { %v993_v4 = vpop.xlane.xlu0 %992 }
 0x492   : > { %1622 = vrcp.f32 %v993_v4 }
 0x494   : > { %v1621_v1 = vpop.eup %1620 }
 0x495   : > { %v1047_v2 = vsel %vm846_vm9, %v1621_v1, 0.0 }
 0x496   : > { %1048 = vadd.xlane.f32.xlu2 %v1047_v2  ;;  %v1491_v2 = vld [vmem:[%s2291_s6] sm:$0xff] }
 0x498   : > { %v1623_v5 = vpop.eup %1622 }
 0x499   : > { %v995_v7 = vmul.f32 %v1623_v5, %v1617_v54 }
 0x49b   : > { %v996_v10 = vpack.c.bf16 %v995_v7, %v995_v7 }
 0x4a4   : > { %v998_v8 = vpop.permute.xlu0 %997 }
 0x4a5   : > { %v1003_v9 = vsel %vm886_vm10, %v998_v8, 0 }
 0x4a6   : > { %1012 = vmatpush.bf16.msrb.mxu2 %v1003_v9 }
 0x4a9   : > { %1441 = vmatmul.msk.bf16.vlgmr.msrb.gmra.mxu2 %vm846_vm9, %v996_v10 }
 0x4aa   : > { %1191 = vmatpush.bf16.msra.mxu2 %v1490_v47 }
 0x4ae   : > { %1053 = vrot.lane.b32.xlu2 %v2120_v6, %s1857_s18  ;;  %1192 = vmatpush.bf16.msra.mxu2 %v1489_v48 }
 0x4f9   : > { %v937_v12 = vpop.xlane.xlu2 %936 }
 0x4fa   : > { %1624 = vrcp.f32 %v937_v12  ;;  %v1605_v12 = vld [vmem:[%s2295_s24] ss:$0 sm:$0xff] }
 0x500   : > { %v1625_v13 = vpop.eup %1624 }
 0x501   : > { %v939_v14 = vmul.f32 %v1625_v13, %v1619_v60 }
 0x503   : > { %v940_v15 = vpack.c.bf16 %v939_v14, %v939_v14 }
 0x505   : > { %1439 = vmatmul.msk.bf16.vlgmr.msrb.gmra.mxu0 %vm846_vm9, %v940_v15 }
 0x509   : > { %v1049_v16 = vpop.xlane.xlu2 %1048 }
 0x50a   : > { %1626 = vrcp.f32 %v1049_v16 }
 0x510   : > { %v1627_v17 = vpop.eup %1626 }
 0x511   : > { %v1051_v18 = vmul.f32 %v1627_v17, %v1621_v1  ;;  %v1054_v19 = vpop.permute.xlu2 %1053  ;;  %v1492_v1 = vld [vmem:[%s2291_s6 + $0x8] sm:$0xff] }
 0x512   : > { %v1059_v20 = vsel %vm886_vm10, %v1054_v19, 0 }
 0x513   : > { %v1052_v21 = vpack.c.bf16 %v1051_v18, %v1051_v18  ;;  %1068 = vmatpush.bf16.msra.mxu0 %v1059_v20 }
 0x516   : > { %1443 = vmatmul.msk.bf16.vlgmr.msra.gmra.mxu0 %vm846_vm9, %v1052_v21 }
 0x52c   : > { %v1014_v22 = vpop.f32.mrf.mxu2 }
 0x52d   : > { %1079 = vrot.lane.b32.xlu0 %v1014_v22, %s1858_s20 }
 0x534   : > { %v1016_v6 = vpop.f32.mrf.mxu2 }
 0x582   : > { %v958_v23 = vpop.f32.mrf.mxu0 }
 0x583   : > { %1075 = vrot.lane.b32.xlu1 %v958_v23, %s1859_s21  ;;  %s1770_s21 = scalar_lea.hbm %s2297_s1, 16 }
 0x584   : > { %p1772_p12 = scmp.lt.s32.totalorder %s1770_s21, %s1766_s30 }
 0x586   : > { %p1773_p13 = por %p1772_p12, %p1771_p11 }
 0x588   : > { %p1774_p0 = pnand %p1773_p13, %p1769_p10 }
 0x58a   : > { %v960_v24 = vpop.f32.mrf.mxu0 }
 0x593   : > { %v1070_v25 = vpop.f32.mrf.mxu0 }
 0x594   : > { %1083 = vrot.lane.b32.xlu1 %v1070_v25, %s1860_s16  ;;  %s2294_s16 = sld [smem:[#allocation32_spill]] }
 0x59a   : > { %v1604_v4 = vld [vmem:[%s2294_s16] ss:$0 sm:$0xff] }
 0x59b   : > { %v1072_v26 = vpop.f32.mrf.mxu0 }
 0x59f   : > { %v1080_v31 = vpop.permute.xlu0 %1079 }
 0x5f5   : > { %v1076_v29 = vpop.permute.xlu1 %1075 }
 0x5f6   : > { %v1086_v30 = vsel %vm846_vm9, %v2144_v43, %v1076_v29 }
 0x5f7   : > { %v1088_v33 = vsel %vm1087_vm11, %v1086_v30, %v1080_v31 }
 0x606   : > { %v1084_v32 = vpop.permute.xlu1 %1083 }
 0x607   : > { %v1090_v34 = vsel %vm1089_vm12, %v1088_v33, %v1084_v32 }
 0x608   : > { %v1091_v35 = vpack.c.bf16 %v1090_v34, %v1090_v34 }
 0x60a   : > { %1452 = vmatmul.msk.bf16.vlgmr.msra.gmra.mxu1 %vm687_vm0, %v1091_v35 }
 0x687   : > { %v1124_v37 = vpop.f32.mrf.mxu1 }
 0x688   : > { %v1125_v38 = vadd.f32 %v1601_v36, %v1124_v37 }
 0x68a   : > { %v1128_v39 = vadd.f32 %v1125_v38, %v2080_v3  ;;  %v1494_v3 = vld [vmem:[%s2291_s6 + $0x18] sm:$0xff] }
 0x68b   : > { %1244 = vmatpush.bf16.msrb.mxu3 %v1494_v3 }
 0x68c   : > { %v1131_v40 = vsel %vm687_vm0, %v1128_v39, 0.0 }
 0x68d   : > { %1132 = vadd.xlane.f32.xlu2 %v1131_v40 }
 0x68f   : > { %v1126_v41 = vpop.f32.mrf.mxu1  ;;  %1245 = vmatpush.bf16.msrb.mxu3 %v1493_v51 }
 0x693   : > { %1246 = vmatpush.bf16.msrb.mxu3 %v1492_v1 }
 0x697   : > { %1247 = vmatpush.bf16.msrb.mxu3 %v1491_v2 }
 0x700   : > { %v1133_v42 = vpop.xlane.xlu2 %1132 }
 0x701   : > { %v1134_v43 = vmul.f32 %v1133_v42, %v2084_v11 }
 0x703   : > { %v1135_v44 = vsub.f32 %v1128_v39, %v1134_v43 }
 0x705   : > { %v1136_v45 = vmul.f32 %v1135_v44, %v1135_v44 }
 0x707   : > { %v1137_v46 = vsel %vm687_vm0, %v1136_v45, 0.0 }
 0x708   : > { %1138 = vadd.xlane.f32.xlu0 %v1137_v46 }
 0x77b   : > { %v1139_v49 = vpop.xlane.xlu0 %1138 }
 0x77c   : > { %v1140_v50 = vmul.f32 %v1139_v49, %v2084_v11  ;;  %v1602_v11 = vld [vmem:[%s2292_s19] ss:$0 sm:$0xff] }
 0x77e   : > { %v1141_v52 = vadd.f32 1e-05, %v1140_v50 }
 0x780   : > { %1628 = vrsqrt.f32 %v1141_v52  ;;  %vm1148_vm14 = vweird.f32 %v1141_v52 }
 0x786   : > { %v1629_v53 = vpop.eup %1628 }
 0x787   : > { %v1143_v54 = vmul.f32 %v1629_v53, %v1141_v52  ;;  %vm1149_vm13 = vweird.f32 %v1629_v53 }
 0x788   : > { %vm1150_vm15 = vmor %vm1148_vm14, %vm1149_vm13 }
 0x789   : > { %v1144_v55 = vmul.f32 %v1629_v53, %v1143_v54 }
 0x78b   : > { %v1145_v56 = vmul.f32 0.5, %v1144_v55 }
 0x78d   : > { %v1146_v57 = vsub.f32 1.5, %v1145_v56 }
 0x78f   : > { %v1147_v58 = vmul.f32 %v1629_v53, %v1146_v57 }
 0x791   : > { %v1151_v59 = vsel %vm1150_vm15, %v1629_v53, %v1147_v58 }
 0x792   : > { %v1152_v60 = vmul.f32 %v1151_v59, %v1135_v44 }
 0x794   : > { %v1156_v62 = vmul.f32 %v1602_v11, %v1152_v60 }
 0x796   : > { %v1160_v63 = vadd.f32 %v1603_v61, %v1156_v62 }
 0x798   : > { %v1161_v0 = vpack.c.bf16 %v1160_v63, %v1160_v63 }
 0x79a   : > { %1461 = vmatmul.msk.bf16.vlgmr.msra.gmra.mxu2 %vm687_vm0, %v1161_v0 }
 0x81d   : > { %v1194_v5 = vpop.f32.mrf.mxu2 }
 0x81e   : > { %v1195_v7 = vadd.f32 %v1604_v4, %v1194_v5 }
 0x820   : > { %v1198_v8 = vmax.f32 %v1195_v7, 0.0 }
 0x822   : > { %v1199_v9 = vpack.c.bf16 %v1198_v8, %v1198_v8 }
 0x824   : > { %1478 = vmatmul.msk.bf16.vlgmr.msrb.gmra.mxu3 %vm1236_vm1, %v1199_v9 }
 0x825   : > { %v1196_v10 = vpop.f32.mrf.mxu2 }
 0x8a7   : > { %v1249_v13 = vpop.f32.mrf.mxu3 }
 0x8a8   : > { %v1250_v14 = vadd.f32 %v1605_v12, %v1249_v13 }
 0x8aa   : > { %v1253_v15 = vadd.f32 %v1250_v14, %v1128_v39 }
 0x8ac   : > { %1254 = vst.msk [vmem:[%s668_s17] sm:$0xff] %vm687_vm0, %v1253_v15 }
 0x8ad   : > { %1777 = shalt.err (!%p1774_p0)
}
 0x8ae   : > { %1507 = dma.vmem_to_hbm [thread:$0]  (%p2025_p2), %s1270_s0, 128, %s1272_s23, %s1256_s27  }
 0x8af   : > { %v1251_v16 = vpop.f32.mrf.mxu3 }
 0x8b0 PF: > { %s2299_s12 = sld [smem:[#allocation17_spill]]  ;;  %p1524_p4 = pnand %p1409_p6, %p2032_p5 }
 0x8b2   : > { %p1525_p7 = pneg %p1524_p4 }
 0x8b6   : > { %s1283_s14 = sand.u32 1, %s2299_s12  }
 0x8b7   : > { %s1284_s15 = scalar_lea.sflag [#allocation5], %s1283_s14 }
 0x8b8   : > { %1819 = dma.done.wait (%p1525_p7), %s1284_s15, 128  }
 0x8b9   : > { %1821 = vsyncadd (%p1525_p7), %s1284_s15, 4294967168  ;;  %s37_s29 = sadd.s32 1, %s1844_s29   ;;  %s2301_s8 = sld [smem:[#allocation18_spill]] }
 0x8ba   : > { %p34_p8 = scmp.ge.s32.totalorder %s37_s29, 4   ;;  %s2302_s26 = sld [smem:[#allocation21_spill]] }
 0x8bb   : > { %s2303_s11 = sld [smem:[#allocation19_spill]]  ;;  %s2304_s24 = smov %s1828_s25 }
 0x8bc   : > { %s2306_s27 = smov %s1840_s28 }
 0x8bd   :  { %36 = sbr.rel (!%p34_p8) target bundleno = 23 (0x17), region = 161 }
 0x8bf   : > { %s2305_s25 = smov %s2301_s8 }
 0x8c1   : > { %s2307_s28 = smov %s2303_s11 }
 0x8c2   :  { %1290 = vsyncpa [#allocation4], 1 }
 0x8c3   :  { %1292 = vsyncpa [#allocation4 + $0x1], 1 }
 0x8c4   :  { %1293 = vsyncpa [#allocation7], 1 }
 0x8c5   :  { %1295 = vsyncpa [#allocation7 + $0x1], 1 }
 0x8c6   :  { %1296 = vsyncpa [#allocation10], 1 }
 0x8c7   :  { %1297 = vsyncpa [#allocation5], 1 }
 0x8c8   :  { %1299 = vsyncpa [#allocation5 + $0x1], 1 }

</bundles_post_ra>
